<compile_context>
chip_gen: v5e
topology: v5e:2x2
jax: 0.10.0
libtpu: 0.0.40
codegen_flags: <defaults>
</compile_context>

<pallas_src>
import functools
from typing import NamedTuple

import jax
import jax.numpy as jnp
import numpy as np
from jax.experimental import pallas as pl
from jax.experimental.pallas import tpu as pltpu


def _round_up(x, m):
    return (x + m - 1) // m * m


# ---------------------------------------------------------------------------
# Kernel body (one batch tile)
# ---------------------------------------------------------------------------
def _actor_kernel(obs_ref, w0_ref, b0_ref, w1_ref, b1_ref, wh_ref, bh_ref,
                  out_ref, *, action_dim, log_std_min, log_std_max):
    """One batch-tile of the DiagGaussianActor forward (hidden_depth = 2)."""
    x = obs_ref[...].astype(jnp.bfloat16)            # (bt, obs_dim); cast in-kernel

    # trunk: Linear -> ReLU -> Linear -> ReLU -> fused (mu | log_std) head
    h = jnp.dot(x, w0_ref[...], preferred_element_type=jnp.float32) + b0_ref[...]
    h = jnp.maximum(h, 0.0).astype(jnp.bfloat16)
    h = jnp.dot(h, w1_ref[...], preferred_element_type=jnp.float32) + b1_ref[...]
    h = jnp.maximum(h, 0.0).astype(jnp.bfloat16)
    y = jnp.dot(h, wh_ref[...], preferred_element_type=jnp.float32) + bh_ref[...]

    # Columns [0, A) hold mu; columns [A, 2A) hold log_std; the rest is lane
    # padding. tanh/exp run on the EUP slot and are effectively free filler.
    ls = jnp.tanh(y)
    ls = log_std_min + 0.5 * (log_std_max - log_std_min) * (ls + 1.0)
    std = jnp.exp(ls)
    col = jax.lax.broadcasted_iota(jnp.int32, y.shape, 1)
    out_ref[...] = jnp.where(col >= action_dim, std, y).astype(out_ref.dtype)


# ---------------------------------------------------------------------------
# Parameter preparation (done once, outside the per-call forward path)
# ---------------------------------------------------------------------------
class PreparedParams(NamedTuple):
    w0: jax.Array     # (obs_dim, H_pad)   bf16
    b0: jax.Array     # (1, H_pad)         f32
    w1: jax.Array     # (H_pad, H_pad)     bf16
    b1: jax.Array     # (1, H_pad)         f32
    wh: jax.Array     # (H_pad, OUT_pad)   bf16  (fused mu | log_std head)
    bh: jax.Array     # (1, OUT_pad)       f32
    obs_dim: int
    action_dim: int
    hidden_pad: int
    out_pad: int


def prepare_params(params):
    """Pad / bf16-cast the trunk weights ONCE. Zero padding is a math no-op."""
    w0, b0, w1, b1, w2, b2 = params
    obs_dim, H = w0.shape
    two_a = w2.shape[1]
    H_pad = _round_up(H, 128)
    OUT_pad = max(128, _round_up(two_a, 128))

    def pad2(a, rows, cols, dtype):
        a = jnp.asarray(a, dtype)
        return jnp.pad(a, ((0, rows - a.shape[0]), (0, cols - a.shape[1])))

    return PreparedParams(
        w0=pad2(w0, obs_dim, H_pad, jnp.bfloat16),            # K axis left unpadded
        b0=pad2(b0.reshape(1, -1), 1, H_pad, jnp.float32),
        w1=pad2(w1, H_pad, H_pad, jnp.bfloat16),
        b1=pad2(b1.reshape(1, -1), 1, H_pad, jnp.float32),
        wh=pad2(w2, H_pad, OUT_pad, jnp.bfloat16),
        bh=pad2(b2.reshape(1, -1), 1, OUT_pad, jnp.float32),
        obs_dim=int(obs_dim),
        action_dim=int(two_a) // 2,
        hidden_pad=int(H_pad),
        out_pad=int(OUT_pad),
    )


def _pick_batch_tile(B):
    if B >= 2048:
        tile = 512          # per-step overhead amortization; still tiny in VMEM
    elif B >= 512:
        tile = 256
    elif B >= 256:
        # v6e: one 256-row step fills the 256-wide MXU. On v7x pass
        # batch_tile=128 explicitly to get >=2 steps for the two TensorCores.
        tile = 256
    else:
        tile = max(8, _round_up(B, 8))   # toy batch: single grid step
    # v7x megacore: keep the step count even so both TensorCores get equal work.
    steps = pl.cdiv(B, tile)
    if steps >= 3 and steps % 2 == 1 and tile >= 256:
        tile //= 2
    return tile


# ---------------------------------------------------------------------------
# Forward wrapper
# ---------------------------------------------------------------------------
def diag_gaussian_actor_forward(obs, params, log_std_bounds=(-5.0, 2.0),
                                batch_tile=None):
    """Returns (mu, std) of the SquashedNormal produced by DiagGaussianActor."""
    if not isinstance(params, PreparedParams):
        params = prepare_params(params)      # fallback; prefer hoisting this call
    p = params
    B, obs_dim = obs.shape
    assert obs_dim == p.obs_dim, "obs feature dim mismatch with prepared params"
    A, H_pad, OUT_pad = p.action_dim, p.hidden_pad, p.out_pad
    two_a = 2 * A
    lo, hi = log_std_bounds

    if batch_tile is None:
        batch_tile = _pick_batch_tile(B)
    B_pad = _round_up(B, batch_tile)
    if B_pad != B:                           # row-pad only; never the feature axis
        obs = jnp.pad(obs, ((0, B_pad - B), (0, 0)))

    num_steps = B_pad // batch_tile
    grid = (num_steps,)
    batched = lambda i: (i, 0)               # tile over the batch axis
    replicated = lambda i: (0, 0)            # weights resident for every tile

    # obs: 3-deep buffering only when the kernel is mem-bound (small hidden) and
    # there are enough steps to pipeline; otherwise keep the default 2 buffers.
    obs_kwargs = {}
    if H_pad <= 256 and num_steps >= 4:
        obs_kwargs["pipeline_mode"] = pl.Buffered(3)
    obs_spec = pl.BlockSpec((batch_tile, obs_dim), batched, **obs_kwargs)

    # Constant-index weights/biases: single buffer (double-buffering them is
    # pure dead VMEM since they are DMA'd exactly once).
    def wspec(shape):
        return pl.BlockSpec(shape, replicated, pipeline_mode=pl.Buffered(1))

    kernel = functools.partial(_actor_kernel, action_dim=A,
                               log_std_min=float(lo), log_std_max=float(hi))

    weight_bytes = ((p.w0.size + p.w1.size + p.wh.size) * 2
                    + (p.b0.size + p.b1.size + p.bh.size) * 4)
    flops = 2 * B_pad * (obs_dim * H_pad + H_pad * H_pad + H_pad * OUT_pad)
    transcendentals = 2 * B_pad * OUT_pad                 # tanh + exp per element
    bytes_accessed = (B_pad * obs_dim * 4 + weight_bytes + B_pad * OUT_pad * 2)

    # Explicit scoped-VMEM limit once the weights get large (v5e default = 16 MiB).
    vmem_est = (weight_bytes
                + 2 * batch_tile * obs_dim * 4            # double-buffered obs
                + 2 * batch_tile * OUT_pad * 2            # double-buffered out
                + 4 * batch_tile * H_pad * 4)             # f32 activation headroom
    compiler_kwargs = dict(dimension_semantics=("parallel",))
    if vmem_est > (12 << 20):
        compiler_kwargs["vmem_limit_bytes"] = int(
            min(64 << 20, vmem_est * 3 // 2 + (4 << 20)))

    out = pl.pallas_call(
        kernel,
        out_shape=jax.ShapeDtypeStruct((B_pad, OUT_pad), jnp.bfloat16),
        grid_spec=pltpu.PrefetchScalarGridSpec(
            num_scalar_prefetch=0,
            grid=grid,
            in_specs=[
                obs_spec,                                  # obs (unpadded features)
                wspec((obs_dim, H_pad)),                   # W0
                wspec((1, H_pad)),                         # b0
                wspec((H_pad, H_pad)),                     # W1
                wspec((1, H_pad)),                         # b1
                wspec((H_pad, OUT_pad)),                   # W_head (mu | log_std)
                wspec((1, OUT_pad)),                       # b_head
            ],
            out_specs=pl.BlockSpec((batch_tile, OUT_pad), batched),
        ),
        compiler_params=pltpu.CompilerParams(**compiler_kwargs),
        cost_estimate=pl.CostEstimate(
            flops=flops, transcendentals=transcendentals,
            bytes_accessed=bytes_accessed),
    )(obs, p.w0, p.b0, p.w1, p.b1, p.wh, p.bh)

    packed = out[:B, :two_a]     # single contiguous slice of the real columns
    mu = packed[:, :A].astype(jnp.float32)
    std = packed[:, A:].astype(jnp.float32)
    return mu, std


# ---------------------------------------------------------------------------
# Synthetic init + pure-JAX reference
# ---------------------------------------------------------------------------
def init_params(key, obs_dim, action_dim, hidden_dim):
    """Deterministic synthetic init (stands in for utils.weight_init / orthogonal)."""
    ks = jax.random.split(key, 3)

    def linear(k, fan_in, fan_out):
        kw, kb = jax.random.split(k)
        scale = 1.0 / np.sqrt(fan_in)
        w = jax.random.normal(kw, (fan_in, fan_out), jnp.float32) * scale
        b = jax.random.normal(kb, (fan_out,), jnp.float32) * 0.01
        return w, b

    w0, b0 = linear(ks[0], obs_dim, hidden_dim)
    w1, b1 = linear(ks[1], hidden_dim, hidden_dim)
    # Final layer produces 2*action_dim columns; first action_dim are mu, the
    # rest log_std -- identical to torch.chunk(2, dim=-1) on the output.
    w2, b2 = linear(ks[2], hidden_dim, 2 * action_dim)
    return (w0, b0, w1, b1, w2, b2)


def _reference_forward(obs, params, log_std_bounds):
    """Pure-JAX reference mirroring the PyTorch forward (with matching bf16 casts)."""
    w0, b0, w1, b1, w2, b2 = params
    lo, hi = log_std_bounds
    A = w2.shape[1] // 2
    f32 = lambda a: a.astype(jnp.bfloat16).astype(jnp.float32)
    h = jnp.maximum(f32(obs) @ f32(w0) + b0, 0.0)
    h = jnp.maximum(f32(h) @ f32(w1) + b1, 0.0)
    y = f32(h) @ f32(w2) + b2
    mu, log_std = y[:, :A], y[:, A:]
    log_std = jnp.tanh(log_std)
    log_std = lo + 0.5 * (hi - lo) * (log_std + 1.0)
    return mu, jnp.exp(log_std)


if __name__ == "__main__":
    # small, module-consistent shapes
    B, OBS_DIM, ACTION_DIM, HIDDEN_DIM = 16, 32, 4, 32
    LOG_STD_BOUNDS = (-5.0, 2.0)
    # TODO(synk): hidden_depth is fixed to 2 in-kernel; other depths need a different
    # kernel signature (one matmul per layer). The SquashedNormal object itself
    # (sampling / log_prob) is a distribution abstraction, not a kernel op; the
    # kernel returns its (mu, std) parameters.

    key = jax.random.PRNGKey(0)
    k_obs, k_par, k_obs2 = jax.random.split(key, 3)
    obs = jax.random.normal(k_obs, (B, OBS_DIM), jnp.float32)
    params = init_params(k_par, OBS_DIM, ACTION_DIM, HIDDEN_DIM)

    # Weight padding / bf16 cast is done ONCE here, not inside the forward call.
    prepped = prepare_params(params)
    jax.block_until_ready(prepped[:6])

    mu, std = diag_gaussian_actor_forward(obs, prepped, LOG_STD_BOUNDS)
    jax.block_until_ready((mu, std))

    mu_ref, std_ref = _reference_forward(obs, params, LOG_STD_BOUNDS)
    # bf16 MXU inputs + bf16 output store -> ~1e-2 tolerance.
    np.testing.assert_allclose(np.asarray(mu), np.asarray(mu_ref), rtol=1e-2, atol=1e-2)
    np.testing.assert_allclose(np.asarray(std), np.asarray(std_ref), rtol=1e-2, atol=1e-2)

    # Second check: batch not divisible by the tile -> row padding + 2-step grid.
    B2 = 300
    obs2 = jax.random.normal(k_obs2, (B2, OBS_DIM), jnp.float32)
    mu2, std2 = diag_gaussian_actor_forward(obs2, prepped, LOG_STD_BOUNDS)
    jax.block_until_ready((mu2, std2))
    mu2_ref, std2_ref = _reference_forward(obs2, params, LOG_STD_BOUNDS)
    np.testing.assert_allclose(np.asarray(mu2), np.asarray(mu2_ref), rtol=1e-2, atol=1e-2)
    np.testing.assert_allclose(np.asarray(std2), np.asarray(std2_ref), rtol=1e-2, atol=1e-2)

    print("KERNEL_OK")
</pallas_src>

<mosaic_0001>
module attributes {stable_mosaic.version = 11 : i64} {
  func.func @_actor_kernel(%arg0: i32, %arg1: memref<16x32xf32, #tpu.memory_space<vmem>>, %arg2: memref<32x128xbf16, #tpu.memory_space<vmem>>, %arg3: memref<1x128xf32, #tpu.memory_space<vmem>>, %arg4: memref<128x128xbf16, #tpu.memory_space<vmem>>, %arg5: memref<1x128xf32, #tpu.memory_space<vmem>>, %arg6: memref<128x128xbf16, #tpu.memory_space<vmem>>, %arg7: memref<1x128xf32, #tpu.memory_space<vmem>>, %arg8: memref<16x128xbf16, #tpu.memory_space<vmem>>) attributes {dimension_semantics = [#tpu.dimension_semantics<parallel>], iteration_bounds = array<i64: 1>, scalar_prefetch = 0 : i64, scratch_operands = 0 : i64, tpu.core_type = #tpu.core_type<tc>, window_params = [{transform_indices = @transform_0, window_bounds = array<i64: 16, 32>}, {pipeline_mode = #tpu.pipeline_mode<synchronous>, transform_indices = @transform_1, window_bounds = array<i64: 32, 128>}, {pipeline_mode = #tpu.pipeline_mode<synchronous>, transform_indices = @transform_2, window_bounds = array<i64: 1, 128>}, {pipeline_mode = #tpu.pipeline_mode<synchronous>, transform_indices = @transform_3, window_bounds = array<i64: 128, 128>}, {pipeline_mode = #tpu.pipeline_mode<synchronous>, transform_indices = @transform_4, window_bounds = array<i64: 1, 128>}, {pipeline_mode = #tpu.pipeline_mode<synchronous>, transform_indices = @transform_5, window_bounds = array<i64: 128, 128>}, {pipeline_mode = #tpu.pipeline_mode<synchronous>, transform_indices = @transform_6, window_bounds = array<i64: 1, 128>}, {transform_indices = @transform_7, window_bounds = array<i64: 16, 128>}]} {
    %c0 = arith.constant 0 : index
    %c0_0 = arith.constant 0 : index
    %0 = vector.load %arg1[%c0, %c0_0] : memref<16x32xf32, #tpu.memory_space<vmem>>, vector<16x32xf32>
    %1 = arith.truncf %0 : vector<16x32xf32> to vector<16x32xbf16>
    %c0_1 = arith.constant 0 : index
    %c0_2 = arith.constant 0 : index
    %2 = vector.load %arg2[%c0_1, %c0_2] : memref<32x128xbf16, #tpu.memory_space<vmem>>, vector<32x128xbf16>
    %cst = arith.constant dense<0.000000e+00> : vector<16x128xf32>
    %3 = tpu.matmul %1, %2, %cst {dimension_numbers = #tpu.dot_dimension_numbers<[1], [0], [0], [1], [0, 0, 1, 1], [], []>} : vector<16x32xbf16>, vector<32x128xbf16>, vector<16x128xf32> -> vector<16x128xf32>
    %c0_3 = arith.constant 0 : index
    %c0_4 = arith.constant 0 : index
    %4 = vector.load %arg3[%c0_3, %c0_4] : memref<1x128xf32, #tpu.memory_space<vmem>>, vector<1x128xf32>
    %5 = vector.broadcast %4 : vector<1x128xf32> to vector<16x128xf32>
    %6 = arith.addf %3, %5 : vector<16x128xf32>
    %cst_5 = arith.constant 0.000000e+00 : f32
    %7 = vector.broadcast %cst_5 : f32 to vector<16x128xf32>
    %8 = arith.maximumf %6, %7 : vector<16x128xf32>
    %9 = arith.truncf %8 : vector<16x128xf32> to vector<16x128xbf16>
    %c0_6 = arith.constant 0 : index
    %c0_7 = arith.constant 0 : index
    %10 = vector.load %arg4[%c0_6, %c0_7] : memref<128x128xbf16, #tpu.memory_space<vmem>>, vector<128x128xbf16>
    %cst_8 = arith.constant dense<0.000000e+00> : vector<16x128xf32>
    %11 = tpu.matmul %9, %10, %cst_8 {dimension_numbers = #tpu.dot_dimension_numbers<[1], [0], [0], [1], [0, 0, 1, 1], [], []>} : vector<16x128xbf16>, vector<128x128xbf16>, vector<16x128xf32> -> vector<16x128xf32>
    %c0_9 = arith.constant 0 : index
    %c0_10 = arith.constant 0 : index
    %12 = vector.load %arg5[%c0_9, %c0_10] : memref<1x128xf32, #tpu.memory_space<vmem>>, vector<1x128xf32>
    %13 = vector.broadcast %12 : vector<1x128xf32> to vector<16x128xf32>
    %14 = arith.addf %11, %13 : vector<16x128xf32>
    %cst_11 = arith.constant 0.000000e+00 : f32
    %15 = vector.broadcast %cst_11 : f32 to vector<16x128xf32>
    %16 = arith.maximumf %14, %15 : vector<16x128xf32>
    %17 = arith.truncf %16 : vector<16x128xf32> to vector<16x128xbf16>
    %c0_12 = arith.constant 0 : index
    %c0_13 = arith.constant 0 : index
    %18 = vector.load %arg6[%c0_12, %c0_13] : memref<128x128xbf16, #tpu.memory_space<vmem>>, vector<128x128xbf16>
    %cst_14 = arith.constant dense<0.000000e+00> : vector<16x128xf32>
    %19 = tpu.matmul %17, %18, %cst_14 {dimension_numbers = #tpu.dot_dimension_numbers<[1], [0], [0], [1], [0, 0, 1, 1], [], []>} : vector<16x128xbf16>, vector<128x128xbf16>, vector<16x128xf32> -> vector<16x128xf32>
    %c0_15 = arith.constant 0 : index
    %c0_16 = arith.constant 0 : index
    %20 = vector.load %arg7[%c0_15, %c0_16] : memref<1x128xf32, #tpu.memory_space<vmem>>, vector<1x128xf32>
    %21 = vector.broadcast %20 : vector<1x128xf32> to vector<16x128xf32>
    %22 = arith.addf %19, %21 : vector<16x128xf32>
    %23 = math.tanh %22 : vector<16x128xf32>
    %cst_17 = arith.constant 1.000000e+00 : f32
    %24 = vector.broadcast %cst_17 : f32 to vector<16x128xf32>
    %25 = arith.addf %23, %24 : vector<16x128xf32>
    %cst_18 = arith.constant 3.500000e+00 : f32
    %26 = vector.broadcast %cst_18 : f32 to vector<16x128xf32>
    %27 = arith.mulf %26, %25 : vector<16x128xf32>
    %cst_19 = arith.constant -5.000000e+00 : f32
    %28 = vector.broadcast %cst_19 : f32 to vector<16x128xf32>
    %29 = arith.addf %28, %27 : vector<16x128xf32>
    %30 = math.exp %29 : vector<16x128xf32>
    %31 = tpu.iota {dimensions = array<i32: 1>} : vector<16x128xi32>
    %c4_i32 = arith.constant 4 : i32
    %32 = vector.broadcast %c4_i32 : i32 to vector<16x128xi32>
    %33 = arith.cmpi sge, %31, %32 : vector<16x128xi32>
    %34 = arith.select %33, %30, %22 : vector<16x128xi1>, vector<16x128xf32>
    %35 = arith.truncf %34 : vector<16x128xf32> to vector<16x128xbf16>
    %c0_20 = arith.constant 0 : index
    %c0_21 = arith.constant 0 : index
    %36 = vector.load %arg8[%c0_20, %c0_21] : memref<16x128xbf16, #tpu.memory_space<vmem>>, vector<16x128xbf16>
    tpu.vector_store %arg8[%c0_20, %c0_21], %35 {strides = array<i32>} : memref<16x128xbf16, #tpu.memory_space<vmem>>, vector<16x128xbf16>,
    return
  }
  func.func @transform_0(%arg0: i32) -> (i32, i32) {
    %c0_i32 = arith.constant 0 : i32
    %c0_i32_0 = arith.constant 0 : i32
    return %arg0, %c0_i32 : i32, i32
  }
  func.func @transform_1(%arg0: i32) -> (i32, i32) {
    %c0_i32 = arith.constant 0 : i32
    %c0_i32_0 = arith.constant 0 : i32
    %c0_i32_1 = arith.constant 0 : i32
    return %c0_i32, %c0_i32_0 : i32, i32
  }
  func.func @transform_2(%arg0: i32) -> (i32, i32) {
    %c0_i32 = arith.constant 0 : i32
    %c0_i32_0 = arith.constant 0 : i32
    %c0_i32_1 = arith.constant 0 : i32
    return %c0_i32, %c0_i32_0 : i32, i32
  }
  func.func @transform_3(%arg0: i32) -> (i32, i32) {
    %c0_i32 = arith.constant 0 : i32
    %c0_i32_0 = arith.constant 0 : i32
    %c0_i32_1 = arith.constant 0 : i32
    return %c0_i32, %c0_i32_0 : i32, i32
  }
  func.func @transform_4(%arg0: i32) -> (i32, i32) {
    %c0_i32 = arith.constant 0 : i32
    %c0_i32_0 = arith.constant 0 : i32
    %c0_i32_1 = arith.constant 0 : i32
    return %c0_i32, %c0_i32_0 : i32, i32
  }
  func.func @transform_5(%arg0: i32) -> (i32, i32) {
    %c0_i32 = arith.constant 0 : i32
    %c0_i32_0 = arith.constant 0 : i32
    %c0_i32_1 = arith.constant 0 : i32
    return %c0_i32, %c0_i32_0 : i32, i32
  }
  func.func @transform_6(%arg0: i32) -> (i32, i32) {
    %c0_i32 = arith.constant 0 : i32
    %c0_i32_0 = arith.constant 0 : i32
    %c0_i32_1 = arith.constant 0 : i32
    return %c0_i32, %c0_i32_0 : i32, i32
  }
  func.func @transform_7(%arg0: i32) -> (i32, i32) {
    %c0_i32 = arith.constant 0 : i32
    %c0_i32_0 = arith.constant 0 : i32
    return %arg0, %c0_i32 : i32, i32
  }
}

</mosaic_0001>

<bundles_post_ra>
// kernel: tpu_custom_call.1
= control target key start
LH: loop header
LB: loop body
LE: loop exit
PB: predicated region body
PF: predicated region fallthrough
CT: control target
= control target key end

     0   :  { %12 = vsyncpa [#allocation3], 0  ;;  %s673_s0 = inlined_call_operand.hbm [shape: f32[16,32], index: 0, kind: input, shape index: {}]   ;;  %s674_s1 = inlined_call_operand.hbm [shape: bf16[32,128], index: 1, kind: input, shape index: {}]   ;;  %s675_s2 = inlined_call_operand.vmem [shape: f32[1,128], index: 2, kind: input, shape index: {}]   ;;  %s676_s3 = inlined_call_operand.hbm [shape: bf16[128,128], index: 3, kind: input, shape index: {}]   ;;  %s677_s4 = inlined_call_operand.vmem [shape: f32[1,128], index: 4, kind: input, shape index: {}]   ;;  %s678_s5 = inlined_call_operand.hbm [shape: bf16[128,128], index: 5, kind: input, shape index: {}]   ;;  %s679_s6 = inlined_call_operand.vmem [shape: f32[1,128], index: 6, kind: input, shape index: {}]   ;;  %s680_s7 = inlined_call_operand.hbm [shape: bf16[16,128], index: 7, kind: output, shape index: {}]  }
   0x1   :  { %13 = vsyncpa [#allocation6], 0 }
   0x2   :  { %14 = vsyncpa [#allocation9], 0  ;;  %s33_s26 = sshll.u32 %s674_s1, 4  ;;  %s34_s26 = int_to_ptr.hbm [resolvable:$true] %s33_s26 }
   0x3   :  { %15 = vsyncpa [#allocation4], 0  ;;  %s588_s27 = smov [#allocation5]   ;;  %s20_s8 = sshll.u32 %s673_s0, 4  ;;  %s21_s8 = int_to_ptr.hbm [resolvable:$true] %s20_s8 }
   0x4   :  { %s35_s28 = sshll.u32 %s588_s27, 4  ;;  %s589_s9 = smov 64   ;;  %s36_s28 = int_to_ptr.vmem [resolvable:$true] %s35_s28 }
   0x5   :  { %s590_s10 = smov 4   ;;  %s591_s11 = smov [#allocation2]  }
   0x6   :  { %41 = dma.hbm_to_vmem [thread:$0]  %s34_s26, 256, %s36_s28, [#allocation6], %s589_s9, %s589_s9, %s590_s10  }
   0x7   :  { %s22_s12 = sshll.u32 %s591_s11, 4  ;;  %s592_s1 = smov 128   ;;  %s23_s12 = int_to_ptr.vmem [resolvable:$true] %s22_s12 }
   0x8   :  { %s593_s13 = smov 8   ;;  %s48_s16 = sshll.u32 %s676_s3, 4  ;;  %s49_s16 = int_to_ptr.hbm [resolvable:$true] %s48_s16 }
   0x9   :  { %28 = dma.hbm_to_vmem [thread:$0]  %s21_s8, 256, %s23_s12, [#allocation3], %s592_s1, %s592_s1, %s593_s13  }
   0xa   :  { %s594_s17 = smov [#allocation7]   ;;  %s63_s20 = sshll.u32 %s678_s5, 4  ;;  %s64_s20 = int_to_ptr.hbm [resolvable:$true] %s63_s20 }
   0xb   :  { %s50_s0 = sshll.u32 %s594_s17, 4  ;;  %s595_s21 = smov [#allocation8]   ;;  %s51_s0 = int_to_ptr.vmem [resolvable:$true] %s50_s0 }
   0xc   :  { %56 = dma.hbm_to_vmem [thread:$0]  %s49_s16, 1024, %s51_s0, [#allocation6], %s589_s9, %s589_s9, %s590_s10  }
   0xd   :  { %s65_s22 = sshll.u32 %s595_s21, 4  ;;  %s66_s22 = int_to_ptr.vmem [resolvable:$true] %s65_s22 }
   0xe   :  { %71 = dma.hbm_to_vmem [thread:$0]  %s64_s20, 1024, %s66_s22, [#allocation9], %s589_s9, %s589_s9, %s590_s10  }
   0xf   :  { %580 = dma.done.wait [#allocation3], 256  }
  0x10   :  { %581 = vsyncadd [#allocation3], 4294967040 }
  0x11   :  { %582 = dma.done.wait [#allocation6], 1280  }
  0x12   :  { %583 = vsyncadd [#allocation6], 4294966016 }
  0x13   :  { %584 = dma.done.wait [#allocation9], 1024  }
  0x14   :  { %585 = vsyncadd [#allocation9], 4294966272  ;;  %v418_v0 = vld [vmem:[#allocation5 + $0x8] sm:$0xff]  ;;  %v417_v1 = vld [vmem:[#allocation5] sm:$0xff]  ;;  %vm114_vm0 = vcmask 261120   ;;  %v314_v50 = vlaneseq  ;;  %s329_s28 = sshll.u32 %s680_s7, 4  ;;  %s330_s28 = int_to_ptr.hbm [resolvable:$true] %s329_s28 }
  0x15   :  { %v426_v2 = vld [vmem:[#allocation7 + $0x38] sm:$0xff]  ;;  %124 = vmatpush.bf16.msra.mxu0 %v418_v0  ;;  %v91_v3 = vld [vmem:[#allocation2] sm:$0xff]  ;;  %v92_v4 = vld [vmem:[#allocation2 + $0x8] sm:$0xff] }
  0x16   :  { %203 = vmatpush.bf16.msra.mxu1 %v426_v2  ;;  %v425_v5 = vld [vmem:[#allocation7 + $0x30] sm:$0xff]  ;;  %v93_v6 = vpack.c.bf16 %v92_v4, %v91_v3  ;;  %v424_v7 = vld [vmem:[#allocation7 + $0x28] sm:$0xff]  ;;  %v423_v8 = vld [vmem:[#allocation7 + $0x20] sm:$0xff]  ;;  %v315_v53 = vand.u32 127, %v314_v50 }
  0x17   :  { %v422_v9 = vld [vmem:[#allocation7 + $0x18] sm:$0xff]  ;;  %v421_v10 = vld [vmem:[#allocation7 + $0x10] sm:$0xff]  ;;  %v420_v11 = vld [vmem:[#allocation7 + $0x8] sm:$0xff] }
  0x18   :  { %v419_v12 = vld [vmem:[#allocation7] sm:$0xff]  ;;  %v434_v13 = vld [vmem:[#allocation8 + $0x38] sm:$0xff]  ;;  %v433_v14 = vld [vmem:[#allocation8 + $0x30] sm:$0xff]  ;;  %vm316_vm1 = vcmp.ge.s32.totalorder %v315_v53, 4 }
  0x19   :  { %125 = vmatpush.bf16.msra.mxu0 %v417_v1  ;;  %288 = vmatpush.bf16.msra.mxu2 %v434_v13  ;;  %v432_v15 = vld [vmem:[#allocation8 + $0x28] sm:$0xff]  ;;  %v431_v16 = vld [vmem:[#allocation8 + $0x20] sm:$0xff]  ;;  %v430_v25 = vld [vmem:[#allocation8 + $0x18] sm:$0xff] }
  0x1a   :  { %204 = vmatpush.bf16.msra.mxu1 %v425_v5  ;;  %v449_v18 = vld [vmem:[%s675_s2] ss:$0 sm:$0xff]  ;;  %v429_v26 = vld [vmem:[#allocation8 + $0x10] sm:$0xff]  ;;  %v428_v27 = vld [vmem:[#allocation8 + $0x8] sm:$0xff] }
  0x1b   :  { %v427_v28 = vld [vmem:[#allocation8] sm:$0xff] }
  0x1c   :  { %352 = vmatmul.msk.bf16.vlgmr.msra.gmra.mxu0 %vm114_vm0, %v93_v6  ;;  %v450_v30 = vld [vmem:[%s677_s4] ss:$0 sm:$0xff]  ;;  %s596_s4 = smov [#allocation10]  }
  0x1d   :  { %289 = vmatpush.bf16.msra.mxu2 %v433_v14  ;;  %v451_v37 = vld [vmem:[%s679_s6] ss:$0 sm:$0xff]  ;;  %s327_s6 = sshll.u32 %s596_s4, 4  ;;  %s328_s6 = int_to_ptr.vmem [resolvable:$true] %s327_s6 }
  0x1e   :  { %205 = vmatpush.bf16.msra.mxu1 %v424_v7 }
  0x21   :  { %290 = vmatpush.bf16.msra.mxu2 %v432_v15 }
  0x22   :  { %206 = vmatpush.bf16.msra.mxu1 %v423_v8 }
  0x25   :  { %291 = vmatpush.bf16.msra.mxu2 %v431_v16 }
  0x26   :  { %207 = vmatpush.bf16.msra.mxu1 %v422_v9 }
  0x29   :  { %292 = vmatpush.bf16.msra.mxu2 %v430_v25 }
  0x2a   :  { %208 = vmatpush.bf16.msra.mxu1 %v421_v10 }
  0x2d   :  { %293 = vmatpush.bf16.msra.mxu2 %v429_v26 }
  0x2e   :  { %209 = vmatpush.bf16.msra.mxu1 %v420_v11 }
  0x31   :  { %294 = vmatpush.bf16.msra.mxu2 %v428_v27 }
  0x32   :  { %210 = vmatpush.bf16.msra.mxu1 %v419_v12 }
  0x35   :  { %295 = vmatpush.bf16.msra.mxu2 %v427_v28 }
  0x99   :  { %v127_v17 = vpop.f32.mrf.mxu0 }
  0x9a   :  { %v128_v19 = vadd.f32 %v449_v18, %v127_v17 }
  0x9c   :  { %v132_v22 = vmax.f32 %v128_v19, 0.0 }
  0xa1   :  { %v129_v20 = vpop.f32.mrf.mxu0 }
  0xa2   :  { %v130_v21 = vadd.f32 %v449_v18, %v129_v20 }
  0xa4   :  { %v133_v23 = vmax.f32 %v130_v21, 0.0 }
  0xa6   :  { %v134_v24 = vpack.c.bf16 %v133_v23, %v132_v22 }
  0xa8   :  { %211 = vmatmul.bf16.vlgmr.msra.gmra.mxu1 %v134_v24 }
 0x125   :  { %v212_v29 = vpop.f32.mrf.mxu1 }
 0x126   :  { %v213_v31 = vadd.f32 %v450_v30, %v212_v29 }
 0x128   :  { %v217_v34 = vmax.f32 %v213_v31, 0.0 }
 0x12d   :  { %v214_v32 = vpop.f32.mrf.mxu1 }
 0x12e   :  { %v215_v33 = vadd.f32 %v450_v30, %v214_v32 }
 0x130   :  { %v218_v35 = vmax.f32 %v215_v33, 0.0 }
 0x132   :  { %v219_v36 = vpack.c.bf16 %v218_v35, %v217_v34 }
 0x134   :  { %296 = vmatmul.bf16.vlgmr.msra.gmra.mxu2 %v219_v36 }
 0x1b7   :  { %v297_v38 = vpop.f32.mrf.mxu2 }
 0x1b8   :  { %v298_v39 = vadd.f32 %v451_v37, %v297_v38 }
 0x1ba   :  { %452 = vtanh.f32 %v298_v39 }
 0x1bf   :  { %v299_v40 = vpop.f32.mrf.mxu2 }
 0x1c0   :  { %v453_v41 = vpop.eup %452  ;;  %v300_v42 = vadd.f32 %v451_v37, %v299_v40 }
 0x1c1   :  { %v304_v43 = vadd.f32 1.0, %v453_v41 }
 0x1c2   :  { %454 = vtanh.f32 %v300_v42 }
 0x1c3   :  { %v306_v44 = vmul.f32 3.5, %v304_v43 }
 0x1c5   :  { %v308_v45 = vadd.f32 -5.0, %v306_v44 }
 0x1c7   :  { %v310_v48 = vmul.f32 1.442695, %v308_v45 }
 0x1c8   :  { %v455_v46 = vpop.eup %454 }
 0x1c9   :  { %v305_v47 = vadd.f32 1.0, %v455_v46  ;;  %456 = vpow2.f32 %v310_v48 }
 0x1cb   :  { %v307_v49 = vmul.f32 3.5, %v305_v47 }
 0x1cd   :  { %v309_v51 = vadd.f32 -5.0, %v307_v49 }
 0x1cf   :  { %v312_v52 = vmul.f32 1.442695, %v309_v51  ;;  %v457_v54 = vpop.eup %456 }
 0x1d0   :  { %v317_v56 = vsel %vm316_vm1, %v457_v54, %v298_v39 }
 0x1d1   :  { %458 = vpow2.f32 %v312_v52 }
 0x1d7   :  { %v459_v55 = vpop.eup %458 }
 0x1d8   :  { %v318_v57 = vsel %vm316_vm1, %v459_v55, %v300_v42 }
 0x1d9   :  { %v438_v58 = vpack.c.bf16 %v318_v57, %v317_v56 }
 0x1db   :  { %439 = vst [vmem:[#allocation10] sm:$0xff] %v438_v58  }
 0x1dc   :  { %335 = dma.vmem_to_hbm [thread:$0]  %s328_s6, 128, %s330_s28, [#allocation4], %s589_s9, %s589_s9, %s590_s10  }
 0x1dd   :  { %586 = dma.done.wait [#allocation4], 128  }
 0x1de   :  { %587 = vsyncadd [#allocation4], 4294967168 }
 0x1df   :  { %340 = vsyncpa [#allocation3], 1 }
 0x1e0   :  { %341 = vsyncpa [#allocation6], 1 }
 0x1e1   :  { %342 = vsyncpa [#allocation9], 1 }
 0x1e2   :  { %343 = vsyncpa [#allocation4], 1 }

</bundles_post_ra>
